<compile_context>
chip_gen: v7x
topology: tpu7x:2x2x1
jax: 0.10.0
libtpu: 0.0.40
codegen_flags: <defaults>
</compile_context>

<pallas_src>
import jax
import jax.numpy as jnp
from jax.experimental import pallas as pl
from jax.experimental.pallas import tpu as pltpu


def _round_up(x, m):
    return (x + m - 1) // m * m


# ---------------------------------------------------------------------------
# Kernel
# ---------------------------------------------------------------------------
def m5net_kernel(x_ref,                  # [TB, dense]        f32 (cast in-kernel)
                 w1_ref, b1_ref,         # fused encoder L1:  [dense, 2*enc_h] bf16 / [1, 2*enc_h] f32
                 w2_ref, b2_ref,         # block-diag L2:     [2*enc_h, 2*enc_out] bf16 / [1, 2*enc_out] f32
                 n1_ref, nb1_ref,        # head L1 (alpha folded): [2*enc_out, hidden] bf16 / [1, hidden] f32
                 w3_ref, b3_ref,         # head L2 row/bias:  [1, hidden] f32 / [1, 1] f32
                 out_ref):               # [TB, 1] f32
    # x arrives f32 straight from HBM; the f32->bf16 cast is a cheap VPU op hidden
    # under the DMA pipeline, so the wrapper never does an extra HBM pass over x.
    x = x_ref[...].astype(w1_ref.dtype)                          # [TB, dense] bf16

    # Fused rule+data encoder layer 1 (single MXU pass -> both hidden slabs).
    h1 = jnp.dot(x, w1_ref[...], preferred_element_type=jnp.float32) + b1_ref[...]
    h1 = jnp.maximum(h1, 0.0)

    # Encoder layer 2 via block-diagonal weights -> z = [rule_z | data_z].
    z = jnp.dot(h1.astype(w2_ref.dtype), w2_ref[...],
                preferred_element_type=jnp.float32) + b2_ref[...]

    # Head Linear #1 (alpha / (1-alpha) pre-folded into n1) + ReLU.
    h2 = jnp.dot(z.astype(n1_ref.dtype), n1_ref[...],
                 preferred_element_type=jnp.float32) + nb1_ref[...]
    h2 = jnp.maximum(h2, 0.0)

    # Head Linear #2 (out_features == 1): VPU multiply + lane reduction,
    # avoiding a 1-lane-wide MXU pass.
    out_ref[...] = jnp.sum(h2 * w3_ref[...], axis=-1, keepdims=True) + b3_ref[...]


# ---------------------------------------------------------------------------
# One-time parameter preparation (outside the hot forward path)
# ---------------------------------------------------------------------------
def prepare_params(params, alpha=0.0):
    """Fuse / fold / cast weights once.  O(params), called outside the hot loop."""
    (rw1, rb1, rw2, rb2,
     dw1, db1, dw2, db2,
     nw1, nb1, nw2, nb2) = params

    enc_h = rw1.shape[1]
    enc_out = rw2.shape[1]
    hidden = nw1.shape[1]
    alpha = jnp.float32(alpha)

    # Fused encoder layer 1: one wide matmul produces both hidden slabs.
    w1f = jnp.concatenate([rw1, dw1], axis=1)                     # [dense, 2*enc_h]
    b1f = jnp.concatenate([rb1, db1], axis=1)                     # [1, 2*enc_h]

    # Block-diagonal encoder layer 2 (single MXU pass).  Only worthwhile while
    # 2*enc_h fits one MXU tile (<=128 on v5e, <=256 on v6e/v7x); beyond that the
    # zero blocks cost real vmatmul cycles -> split back into two narrow dots.
    w2bd = jnp.zeros((2 * enc_h, 2 * enc_out), jnp.float32)
    w2bd = w2bd.at[:enc_h, :enc_out].set(rw2)
    w2bd = w2bd.at[enc_h:, enc_out:].set(dw2)
    b2f = jnp.concatenate([rb2, db2], axis=1)                     # [1, 2*enc_out]

    # Fold alpha / (1-alpha) into the head's first-layer weights.
    n1 = jnp.concatenate([alpha * nw1[:enc_out],
                          (1.0 - alpha) * nw1[enc_out:]], axis=0)  # [2*enc_out, hidden]

    w3_row = nw2.reshape(1, hidden)                                # [1, hidden] f32 (VPU path)
    b3 = nb2.reshape(1, 1)                                         # [1, 1]

    # bf16 for everything feeding the MXU; biases / epilogue math stay f32.
    bf16 = jnp.bfloat16
    return (w1f.astype(bf16), b1f,
            w2bd.astype(bf16), b2f,
            n1.astype(bf16), nb1,
            w3_row, b3)


# ---------------------------------------------------------------------------
# Forward wrapper
# ---------------------------------------------------------------------------
def _choose_tile_b(B, requested):
    """Large tiles amortize the ~0.35us/step fixed overhead; multiple of 16;
    keep >= 2 grid steps when the batch allows it (v7x has 2 TensorCores and the
    'parallel' grid axis is how work is sharded across them)."""
    tile = _round_up(max(16, min(int(requested), _round_up(B, 16))), 16)
    if B > 16 and pl.cdiv(B, tile) < 2:
        tile = max(16, _round_up(pl.cdiv(B, 2), 16))
    return tile


def m5net_forward(x_list, name_to_ind, fused_params, merge='cat', tile_b=1024):
    if merge != 'cat':
        # TODO(synk): merge='add' path not implemented (original net's input_dim only
        #             matches the 'cat' merge).
        raise NotImplementedError("only merge='cat' is implemented")

    # glue: pick dense1 and (trivially) concat along last dim; stays f32.
    x = jnp.concatenate([x_list[name_to_ind['dense1']]], axis=-1)
    B, dense = x.shape

    (w1f, b1f, w2bd, b2f, n1, nb1, w3_row, b3) = fused_params
    two_enc_h = w1f.shape[1]
    two_enc_out = w2bd.shape[1]
    hidden = n1.shape[1]

    # ---- batch tiling: ragged grid, no wrapper-side pad or cast over x ----
    tile = _choose_tile_b(B, tile_b)
    grid = (pl.cdiv(B, tile),)

    def const_spec(arr):
        return pl.BlockSpec(arr.shape, lambda i: (0, 0))

    in_specs = [
        pl.BlockSpec((tile, dense), lambda i: (i, 0)),   # x: advances with the grid
        const_spec(w1f), const_spec(b1f),
        const_spec(w2bd), const_spec(b2f),
        const_spec(n1), const_spec(nb1),
        const_spec(w3_row), const_spec(b3),
    ]
    out_specs = pl.BlockSpec((tile, 1), lambda i: (i, 0))

    flops = 2 * B * (dense * two_enc_h
                     + two_enc_h * two_enc_out
                     + two_enc_out * hidden
                     + hidden)
    bytes_accessed = int(
        B * dense * 4                                     # x (f32, read once by the kernel)
        + (w1f.size + w2bd.size + n1.size) * 2            # bf16 weights
        + (b1f.size + b2f.size + nb1.size + w3_row.size + b3.size) * 4
        + B * 4)                                          # output (f32)

    out = pl.pallas_call(
        m5net_kernel,
        out_shape=jax.ShapeDtypeStruct((B, 1), jnp.float32),
        grid=grid,
        in_specs=in_specs,
        out_specs=out_specs,
        compiler_params=pltpu.CompilerParams(
            dimension_semantics=("parallel",),
            vmem_limit_bytes=64 * 1024 * 1024,
        ),
        cost_estimate=pl.CostEstimate(
            flops=flops, transcendentals=0, bytes_accessed=bytes_accessed),
    )(x, w1f, b1f, w2bd, b2f, n1, nb1, w3_row, b3)

    # matches torch .squeeze() for B > 1 (B == 1 returns (1,), a shape nit)
    return out.squeeze(-1)


# ---------------------------------------------------------------------------
# Synthetic parameters / pure-JAX reference
# ---------------------------------------------------------------------------
def init_params(key, dense_dim, enc_hidden, enc_out, hidden_dim):
    """Deterministic synthetic weights. Linear stored as (in, out); bias as (1, out)."""
    ks = jax.random.split(key, 6)

    def lin(k, fan_in, fan_out):
        s = 1.0 / jnp.sqrt(fan_in)
        kw, kb = jax.random.split(k)
        w = jax.random.uniform(kw, (fan_in, fan_out), jnp.float32, -s, s)
        b = jax.random.uniform(kb, (1, fan_out), jnp.float32, -s, s)
        return w, b

    rw1, rb1 = lin(ks[0], dense_dim, enc_hidden)
    rw2, rb2 = lin(ks[1], enc_hidden, enc_out)
    dw1, db1 = lin(ks[2], dense_dim, enc_hidden)
    dw2, db2 = lin(ks[3], enc_hidden, enc_out)
    nw1, nb1 = lin(ks[4], 2 * enc_out, hidden_dim)   # input_dim = rule_out + data_out
    nw2, nb2 = lin(ks[5], hidden_dim, 1)
    return (rw1, rb1, rw2, rb2, dw1, db1, dw2, db2, nw1, nb1, nw2, nb2)


def reference_forward(x_list, name_to_ind, params, alpha=0.0):
    """Plain-JAX f32 reference mirroring the PyTorch forward (merge='cat')."""
    x = jnp.concatenate([x_list[name_to_ind['dense1']]], axis=-1)
    (rw1, rb1, rw2, rb2, dw1, db1, dw2, db2, nw1, nb1, nw2, nb2) = params
    rule_z = jnp.maximum(x @ rw1 + rb1, 0.0) @ rw2 + rb2
    data_z = jnp.maximum(x @ dw1 + db1, 0.0) @ dw2 + db2
    z = jnp.concatenate([alpha * rule_z, (1.0 - alpha) * data_z], axis=-1)
    out = jnp.maximum(z @ nw1 + nb1, 0.0) @ nw2 + nb2
    return out.squeeze(-1)


if __name__ == "__main__":
    # small-but-nontrivial shapes: exercises a 2-step batch grid and a ragged tail block.
    B, DENSE, ENC_H, ENC_OUT, HID = 200, 16, 32, 16, 16
    name_to_ind = {'dense1': 0}

    key = jax.random.PRNGKey(0)
    k_x, k_p = jax.random.split(key)
    dense1 = jax.random.normal(k_x, (B, DENSE), dtype=jnp.float32)
    x_list = [dense1]

    params = init_params(k_p, DENSE, ENC_H, ENC_OUT, HID)
    alpha = 0.3

    # One-time weight fusion outside the hot forward path.
    fused = prepare_params(params, alpha=alpha)
    fused = tuple(jax.block_until_ready(p) for p in fused)

    out = m5net_forward(x_list, name_to_ind, fused, merge='cat', tile_b=1024)
    out = jax.block_until_ready(out)

    ref = reference_forward(x_list, name_to_ind, params, alpha=alpha)
    assert out.shape == (B,), out.shape
    # kernel uses bf16 weights/activations on the MXU path -> loose-ish tolerance vs f32 ref
    assert jnp.allclose(out, ref, atol=5e-2, rtol=5e-2), (out, ref)

    print("KERNEL_OK")
</pallas_src>

<mosaic_0001>
module attributes {stable_mosaic.version = 11 : i64} {
  func.func @m5net_kernel(%arg0: i32, %arg1: memref<112x16xf32, #tpu.memory_space<vmem>>, %arg2: memref<16x64xbf16, #tpu.memory_space<vmem>>, %arg3: memref<1x64xf32, #tpu.memory_space<vmem>>, %arg4: memref<64x32xbf16, #tpu.memory_space<vmem>>, %arg5: memref<1x32xf32, #tpu.memory_space<vmem>>, %arg6: memref<32x16xbf16, #tpu.memory_space<vmem>>, %arg7: memref<1x16xf32, #tpu.memory_space<vmem>>, %arg8: memref<1x16xf32, #tpu.memory_space<vmem>>, %arg9: memref<1x1xf32, #tpu.memory_space<vmem>>, %arg10: memref<112x1xf32, #tpu.memory_space<vmem>>) attributes {dimension_semantics = [#tpu.dimension_semantics<parallel>], iteration_bounds = array<i64: 2>, scalar_prefetch = 0 : i64, scratch_operands = 0 : i64, tpu.core_type = #tpu.core_type<tc>, window_params = [{transform_indices = @transform_0, window_bounds = array<i64: 112, 16>}, {pipeline_mode = #tpu.pipeline_mode<synchronous>, transform_indices = @transform_1, window_bounds = array<i64: 16, 64>}, {pipeline_mode = #tpu.pipeline_mode<synchronous>, transform_indices = @transform_2, window_bounds = array<i64: 1, 64>}, {pipeline_mode = #tpu.pipeline_mode<synchronous>, transform_indices = @transform_3, window_bounds = array<i64: 64, 32>}, {pipeline_mode = #tpu.pipeline_mode<synchronous>, transform_indices = @transform_4, window_bounds = array<i64: 1, 32>}, {pipeline_mode = #tpu.pipeline_mode<synchronous>, transform_indices = @transform_5, window_bounds = array<i64: 32, 16>}, {pipeline_mode = #tpu.pipeline_mode<synchronous>, transform_indices = @transform_6, window_bounds = array<i64: 1, 16>}, {pipeline_mode = #tpu.pipeline_mode<synchronous>, transform_indices = @transform_7, window_bounds = array<i64: 1, 16>}, {pipeline_mode = #tpu.pipeline_mode<synchronous>, transform_indices = @transform_8, window_bounds = array<i64: 1, 1>}, {transform_indices = @transform_9, window_bounds = array<i64: 112, 1>}]} {
    %c0 = arith.constant 0 : index
    %c0_0 = arith.constant 0 : index
    %0 = vector.load %arg1[%c0, %c0_0] : memref<112x16xf32, #tpu.memory_space<vmem>>, vector<112x16xf32>
    %1 = arith.truncf %0 : vector<112x16xf32> to vector<112x16xbf16>
    %c0_1 = arith.constant 0 : index
    %c0_2 = arith.constant 0 : index
    %2 = vector.load %arg2[%c0_1, %c0_2] : memref<16x64xbf16, #tpu.memory_space<vmem>>, vector<16x64xbf16>
    %cst = arith.constant dense<0.000000e+00> : vector<112x64xf32>
    %3 = tpu.matmul %1, %2, %cst {dimension_numbers = #tpu.dot_dimension_numbers<[1], [0], [0], [1], [0, 0, 1, 1], [], []>} : vector<112x16xbf16>, vector<16x64xbf16>, vector<112x64xf32> -> vector<112x64xf32>
    %c0_3 = arith.constant 0 : index
    %c0_4 = arith.constant 0 : index
    %4 = vector.load %arg3[%c0_3, %c0_4] : memref<1x64xf32, #tpu.memory_space<vmem>>, vector<1x64xf32>
    %5 = vector.broadcast %4 : vector<1x64xf32> to vector<112x64xf32>
    %6 = arith.addf %3, %5 : vector<112x64xf32>
    %cst_5 = arith.constant 0.000000e+00 : f32
    %7 = vector.broadcast %cst_5 : f32 to vector<112x64xf32>
    %8 = arith.maximumf %6, %7 : vector<112x64xf32>
    %9 = arith.truncf %8 : vector<112x64xf32> to vector<112x64xbf16>
    %c0_6 = arith.constant 0 : index
    %c0_7 = arith.constant 0 : index
    %10 = vector.load %arg4[%c0_6, %c0_7] : memref<64x32xbf16, #tpu.memory_space<vmem>>, vector<64x32xbf16>
    %cst_8 = arith.constant dense<0.000000e+00> : vector<112x32xf32>
    %11 = tpu.matmul %9, %10, %cst_8 {dimension_numbers = #tpu.dot_dimension_numbers<[1], [0], [0], [1], [0, 0, 1, 1], [], []>} : vector<112x64xbf16>, vector<64x32xbf16>, vector<112x32xf32> -> vector<112x32xf32>
    %c0_9 = arith.constant 0 : index
    %c0_10 = arith.constant 0 : index
    %12 = vector.load %arg5[%c0_9, %c0_10] : memref<1x32xf32, #tpu.memory_space<vmem>>, vector<1x32xf32>
    %13 = vector.broadcast %12 : vector<1x32xf32> to vector<112x32xf32>
    %14 = arith.addf %11, %13 : vector<112x32xf32>
    %15 = arith.truncf %14 : vector<112x32xf32> to vector<112x32xbf16>
    %c0_11 = arith.constant 0 : index
    %c0_12 = arith.constant 0 : index
    %16 = vector.load %arg6[%c0_11, %c0_12] : memref<32x16xbf16, #tpu.memory_space<vmem>>, vector<32x16xbf16>
    %cst_13 = arith.constant dense<0.000000e+00> : vector<112x16xf32>
    %17 = tpu.matmul %15, %16, %cst_13 {dimension_numbers = #tpu.dot_dimension_numbers<[1], [0], [0], [1], [0, 0, 1, 1], [], []>} : vector<112x32xbf16>, vector<32x16xbf16>, vector<112x16xf32> -> vector<112x16xf32>
    %c0_14 = arith.constant 0 : index
    %c0_15 = arith.constant 0 : index
    %18 = vector.load %arg7[%c0_14, %c0_15] : memref<1x16xf32, #tpu.memory_space<vmem>>, vector<1x16xf32>
    %19 = vector.broadcast %18 : vector<1x16xf32> to vector<112x16xf32>
    %20 = arith.addf %17, %19 : vector<112x16xf32>
    %cst_16 = arith.constant 0.000000e+00 : f32
    %21 = vector.broadcast %cst_16 : f32 to vector<112x16xf32>
    %22 = arith.maximumf %20, %21 : vector<112x16xf32>
    %c0_17 = arith.constant 0 : index
    %c0_18 = arith.constant 0 : index
    %23 = vector.load %arg8[%c0_17, %c0_18] : memref<1x16xf32, #tpu.memory_space<vmem>>, vector<1x16xf32>
    %24 = vector.broadcast %23 : vector<1x16xf32> to vector<112x16xf32>
    %25 = arith.mulf %22, %24 : vector<112x16xf32>
    %cst_19 = arith.constant dense<0.000000e+00> : vector<112xf32>
    %26 = vector.multi_reduction <add>, %25, %cst_19 [1] : vector<112x16xf32> to vector<112xf32>
    %27 = vector.shape_cast %26 : vector<112xf32> to vector<112x1xf32>
    %c0_20 = arith.constant 0 : index
    %c0_21 = arith.constant 0 : index
    %28 = vector.load %arg9[%c0_20, %c0_21] : memref<1x1xf32, #tpu.memory_space<vmem>>, vector<1x1xf32>
    %29 = vector.broadcast %28 : vector<1x1xf32> to vector<112x1xf32>
    %30 = arith.addf %27, %29 : vector<112x1xf32>
    %c0_22 = arith.constant 0 : index
    %c0_23 = arith.constant 0 : index
    %31 = vector.load %arg10[%c0_22, %c0_23] : memref<112x1xf32, #tpu.memory_space<vmem>>, vector<112x1xf32>
    tpu.vector_store %arg10[%c0_22, %c0_23], %30 {strides = array<i32>} : memref<112x1xf32, #tpu.memory_space<vmem>>, vector<112x1xf32>,
    return
  }
  func.func @transform_0(%arg0: i32) -> (i32, i32) {
    %c0_i32 = arith.constant 0 : i32
    %c0_i32_0 = arith.constant 0 : i32
    return %arg0, %c0_i32 : i32, i32
  }
  func.func @transform_1(%arg0: i32) -> (i32, i32) {
    %c0_i32 = arith.constant 0 : i32
    %c0_i32_0 = arith.constant 0 : i32
    %c0_i32_1 = arith.constant 0 : i32
    return %c0_i32, %c0_i32_0 : i32, i32
  }
  func.func @transform_2(%arg0: i32) -> (i32, i32) {
    %c0_i32 = arith.constant 0 : i32
    %c0_i32_0 = arith.constant 0 : i32
    %c0_i32_1 = arith.constant 0 : i32
    return %c0_i32, %c0_i32_0 : i32, i32
  }
  func.func @transform_3(%arg0: i32) -> (i32, i32) {
    %c0_i32 = arith.constant 0 : i32
    %c0_i32_0 = arith.constant 0 : i32
    %c0_i32_1 = arith.constant 0 : i32
    return %c0_i32, %c0_i32_0 : i32, i32
  }
  func.func @transform_4(%arg0: i32) -> (i32, i32) {
    %c0_i32 = arith.constant 0 : i32
    %c0_i32_0 = arith.constant 0 : i32
    %c0_i32_1 = arith.constant 0 : i32
    return %c0_i32, %c0_i32_0 : i32, i32
  }
  func.func @transform_5(%arg0: i32) -> (i32, i32) {
    %c0_i32 = arith.constant 0 : i32
    %c0_i32_0 = arith.constant 0 : i32
    %c0_i32_1 = arith.constant 0 : i32
    return %c0_i32, %c0_i32_0 : i32, i32
  }
  func.func @transform_6(%arg0: i32) -> (i32, i32) {
    %c0_i32 = arith.constant 0 : i32
    %c0_i32_0 = arith.constant 0 : i32
    %c0_i32_1 = arith.constant 0 : i32
    return %c0_i32, %c0_i32_0 : i32, i32
  }
  func.func @transform_7(%arg0: i32) -> (i32, i32) {
    %c0_i32 = arith.constant 0 : i32
    %c0_i32_0 = arith.constant 0 : i32
    %c0_i32_1 = arith.constant 0 : i32
    return %c0_i32, %c0_i32_0 : i32, i32
  }
  func.func @transform_8(%arg0: i32) -> (i32, i32) {
    %c0_i32 = arith.constant 0 : i32
    %c0_i32_0 = arith.constant 0 : i32
    %c0_i32_1 = arith.constant 0 : i32
    return %c0_i32, %c0_i32_0 : i32, i32
  }
  func.func @transform_9(%arg0: i32) -> (i32, i32) {
    %c0_i32 = arith.constant 0 : i32
    %c0_i32_0 = arith.constant 0 : i32
    return %arg0, %c0_i32 : i32, i32
  }
}

</mosaic_0001>

<bundles_post_ra>
// kernel: tpu_custom_call.1
= control target key start
LH: loop header
LB: loop body
LE: loop exit
PB: predicated region body
PF: predicated region fallthrough
CT: control target
= control target key end

     0   :  { %s2434_s0 = inlined_call_operand.hbm [shape: f32[200,16], index: 0, kind: input, shape index: {}]   ;;  %s2435_s1 = inlined_call_operand.hbm [shape: bf16[16,64], index: 1, kind: input, shape index: {}]   ;;  %s2436_s2 = inlined_call_operand.hbm [shape: f32[1,64], index: 2, kind: input, shape index: {}]   ;;  %s2437_s3 = inlined_call_operand.hbm [shape: bf16[64,32], index: 3, kind: input, shape index: {}]   ;;  %s2438_s4 = inlined_call_operand.hbm [shape: f32[1,32], index: 4, kind: input, shape index: {}]   ;;  %s2439_s5 = inlined_call_operand.hbm [shape: bf16[32,16], index: 5, kind: input, shape index: {}]   ;;  %s2440_s6 = inlined_call_operand.hbm [shape: f32[1,16], index: 6, kind: input, shape index: {}]   ;;  %s2441_s7 = inlined_call_operand.hbm [shape: f32[1,16], index: 7, kind: input, shape index: {}]   ;;  %s2442_s8 = inlined_call_operand.<no memory space> [shape: f32[1,1], index: 8, kind: input, shape index: {}]   ;;  %s2443_s9 = inlined_call_operand.hbm [shape: f32[200,1], index: 9, kind: output, shape index: {}]  }
   0x1   :  { %2453 = sst [smem:[#allocation29_spill]] %s2435_s1  ;;  %v14_v0 = vstv %s2442_s8 }
   0x2   :  { %2454 = sst [smem:[#allocation30_spill]] %s2443_s9  ;;  %15 = vst [vmem:[#allocation2] sm:$0x1] %v14_v0 }
   0x3   :  { %16 = vsyncpa [#allocation4], 0 }
   0x4   :  { %18 = vsyncpa [#allocation4 + $0x1], 0 }
   0x5   :  { %19 = vsyncpa [#allocation7], 0 }
   0x6   :  { %20 = vsyncpa [#allocation10], 0 }
   0x7   :  { %21 = vsyncpa [#allocation13], 0 }
   0x8   :  { %22 = vsyncpa [#allocation16], 0 }
   0x9   :  { %23 = vsyncpa [#allocation5], 0 }
   0xa   :  { %25 = vsyncpa [#allocation5 + $0x1], 0  ;;  %s1894_s11 = smov 0   ;;  %s1896_s12 = smov 0  }
   0xb   :  { %s1898_s13 = smov 0   ;;  %s1900_s14 = smov 0  }
   0xc LB: > { %2455 = sst [smem:[#allocation24_spill]] %s1810_s11  ;;  %s1915_s8 = sadd.s32 4294967295, %s1822_s14   ;;  %s1822_s14 = sphi %s1900_s14, %s2485_s14   ;;  %s1818_s13 = sphi %s1898_s13, %s2489_s13   ;;  %s1814_s12 = sphi %s1896_s12, %s2488_s12   ;;  %s1810_s11 = sphi %s1894_s11, %s2487_s11  }
   0xd   : > { %s1196_s15 = sadd.s32 4294967294, %s1822_s14   ;;  %s1919_s16 = sadd.s32 1, %s1822_s14  }
   0xe   : > { %2456 = sst [smem:[#allocation25_spill]] %s1919_s16  ;;  %s38_s17 = sadd.s32 1, %s1818_s13 }
   0xf   : > { %s35_s18 = ssub.s32 %s1822_s14, %s1919_s16  ;;  %p45_p0 = scmp.ne.s32.totalorder %s1818_s13, %s1814_s12 }
  0x10   : > { %p36_p1 = scmp.eq.s32.totalorder %s35_s18, 0  ;;  %p46_p2 = scmp.eq.s32.totalorder %s1822_s14, 0 }
  0x11   : > { %p51_p3 = scmp.ne.s32.totalorder %s1814_s12, %s1810_s11  ;;  %p2444_p4 = scmp.eq.s32.totalorder %s1915_s8, 0 }
  0x12   : > { %s1931_s19 = scalar_select %p36_p1, %s1818_s13, %s38_s17  }
  0x13   : > { %p1933_p5 = por %p46_p2, %p45_p0  ;;  %p1939_p6 = por %p2444_p4, %p51_p3 }
  0x14   : > { %2457 = sst [smem:[#allocation26_spill]] %s1931_s19  ;;  %p243_p7 = scmp.eq.s32.totalorder %s1915_s8, 1 }
  0x15   : > { %s2458_s20 = scalar_select %p1933_p5, 1, 0 }
  0x16   : > { %s2459_s21 = scalar_select %p1939_p6, 1, 0 }
  0x17   : > { %p249_p8 = scmp.eq.s32.totalorder %s1196_s15, 1  ;;  %p1197_p9 = scmp.ge.s32.totalorder %s1822_s14, 1 }
  0x18   : > { %p256_p10 = scmp.lt.s32.totalorder %s1822_s14, 3  ;;  %p1946_p11 = por %p243_p7, %p45_p0 }
  0x19   : > { %p1950_p12 = por %p249_p8, %p51_p3  ;;  %s1824_s25 = smov [#allocation6]  }
  0x1a   : > { %s2460_s22 = scalar_select %p1946_p11, 1, 0 }
  0x1b   : > { %s2462_s23 = scalar_select %p1950_p12, 1, 0 }
  0x1c   : > { %2461 = sst [smem:[#allocation27_spill]] %s2460_s22  ;;  %p1954_p13 = pnand %p1197_p9, %p256_p10 }
  0x1d   : > { %2463 = sst [smem:[#allocation28_spill]] %s2462_s23  ;;  %s268_s26 = sshll.u32 %s1824_s25, 4  ;;  %s269_s26 = int_to_ptr.vmem [resolvable:$true] %s268_s26 }
  0x1e   : > { %s2464_s24 = scalar_select %p1954_p13, 1, 0 }
  0x1f   : > { %p1421_p1 = pneg %p1954_p13  ;;  %s1825_s28 = smov [#allocation9]  }
  0x20   : > { %s292_s29 = sshll.u32 %s1825_s28, 4  ;;  %s2466_s1 = sld [smem:[#allocation29_spill]]  ;;  %s1966_s29 = int_to_ptr.vmem [resolvable:$true] %s292_s29 }
  0x21   : > { %p1962_p2 = pnand %p1421_p1, %p2444_p4 }
  0x23   : > { %p1976_p3 = pneg %p1962_p2 }
  0x26   : > { %s1516_s15 = scalar_lea.hbm %s2466_s1, 128 }
  0x27   : > { %p1517_p0 = scmp.ne.s32.totalorder %s2466_s1, %s1516_s15  ;;  %p1523_p9 = scmp.lt.u32.totalorder %s1516_s15, %s2466_s1 }
  0x29   : > { %p1519_p7 = pnand %p1976_p3, %p1517_p0 }
  0x2b   : > { %p1520_p8 = pneg %p1519_p7 }
  0x2d   : > { %p1525_p10 = pnand %p1523_p9, %p1520_p8 }
  0x2f   : > { %1528 = shalt.err (!%p1525_p10)
}
  0x30   : > { %s1529_s30 = scalar_lea.vmem %s269_s26, 128  ;;  %p1537_p11 = scmp.lt.s32.totalorder %s269_s26, %s269_s26 }
  0x31   : > { %p1530_p1 = scmp.ne.s32.totalorder %s269_s26, %s1529_s30  ;;  %p1538_p6 = scmp.lt.s32.totalorder %s1529_s30, %s1529_s30 }
  0x33   : > { %p1532_p4 = pnand %p1530_p1, %p1976_p3  ;;  %p1539_p13 = por %p1538_p6, %p1537_p11 }
  0x35   : > { %p1533_p12 = pneg %p1532_p4 }
  0x37   : > { %p1540_p5 = pnand %p1539_p13, %p1533_p12 }
  0x39   : > { %1543 = shalt.err (!%p1540_p5)
}
  0x3a   : > { %s1826_s10 = smov 64   ;;  %s1827_s17 = smov 4  }
  0x3b   : > { %1424 = dma.hbm_to_vmem [thread:$0]  (!%p1962_p2), %s2466_s1, 128, %s269_s26, [#allocation7], %s1826_s10, %s1826_s10, %s1827_s17  }
  0x3c   : > { %s1544_s16 = scalar_lea.hbm %s2437_s3, 512 }
  0x3d   : > { %p1545_p4 = scmp.ne.s32.totalorder %s2437_s3, %s1544_s16  ;;  %p1551_p11 = scmp.lt.u32.totalorder %s1544_s16, %s2437_s3 }
  0x3f   : > { %p1547_p5 = pnand %p1545_p4, %p1976_p3 }
  0x41   : > { %p1548_p6 = pneg %p1547_p5 }
  0x43   : > { %p1553_p12 = pnand %p1551_p11, %p1548_p6 }
  0x45   : > { %1556 = shalt.err (!%p1553_p12)
}
  0x46   : > { %s1557_s26 = scalar_lea.vmem %s1966_s29, 512  ;;  %p1565_p8 = scmp.lt.s32.totalorder %s1966_s29, %s1966_s29 }
  0x47   : > { %p1558_p13 = scmp.ne.s32.totalorder %s1966_s29, %s1557_s26  ;;  %p1566_p9 = scmp.lt.s32.totalorder %s1557_s26, %s1557_s26 }
  0x49   : > { %p1560_p0 = pnand %p1558_p13, %p1976_p3  ;;  %p1567_p10 = por %p1566_p9, %p1565_p8 }
  0x4b   : > { %p1561_p7 = pneg %p1560_p0 }
  0x4d   : > { %p1568_p1 = pnand %p1567_p10, %p1561_p7 }
  0x4f   : > { %1571 = shalt.err (!%p1568_p1)
}
  0x50   : > { %1430 = dma.hbm_to_vmem [thread:$0]  (!%p1962_p2), %s2437_s3, 512, %s1966_s29, [#allocation10], %s1826_s10, %s1826_s10, %s1827_s17  }
  0x51   : > { %s1828_s16 = smov [#allocation12]   ;;  %s1829_s19 = smov [#allocation8]  }
  0x52   : > { %s316_s23 = sshll.u32 %s1828_s16, 4  ;;  %s282_s15 = sshll.u32 %s1829_s19, 4  ;;  %s317_s23 = int_to_ptr.vmem [resolvable:$true] %s316_s23  ;;  %s283_s15 = int_to_ptr.vmem [resolvable:$true] %s282_s15 }
  0x53   : > { %s1572_s30 = scalar_lea.hbm %s2439_s5, 256 }
  0x54   : > { %p1573_p4 = scmp.ne.s32.totalorder %s2439_s5, %s1572_s30  ;;  %p1579_p11 = scmp.lt.u32.totalorder %s1572_s30, %s2439_s5 }
  0x56   : > { %p1575_p5 = pnand %p1573_p4, %p1976_p3 }
  0x58   : > { %p1576_p6 = pneg %p1575_p5 }
  0x5a   : > { %p1581_p12 = pnand %p1579_p11, %p1576_p6 }
  0x5c   : > { %1584 = shalt.err (!%p1581_p12)
}
  0x5d   : > { %s1585_s29 = scalar_lea.vmem %s317_s23, 256  ;;  %p1593_p8 = scmp.lt.s32.totalorder %s317_s23, %s317_s23 }
  0x5e   : > { %p1586_p13 = scmp.ne.s32.totalorder %s317_s23, %s1585_s29  ;;  %p1594_p9 = scmp.lt.s32.totalorder %s1585_s29, %s1585_s29 }
  0x60   : > { %p1588_p0 = pnand %p1586_p13, %p1976_p3  ;;  %p1595_p10 = por %p1594_p9, %p1593_p8 }
  0x62   : > { %p1589_p7 = pneg %p1588_p0 }
  0x64   : > { %p1596_p1 = pnand %p1595_p10, %p1589_p7 }
  0x66   : > { %1599 = shalt.err (!%p1596_p1)
}
  0x67   : > { %1436 = dma.hbm_to_vmem [thread:$0]  (!%p1962_p2), %s2439_s5, 256, %s317_s23, [#allocation13], %s1826_s10, %s1826_s10, %s1827_s17  }
  0x68   : > { %s1600_s19 = scalar_lea.hbm %s2436_s2, 16 }
  0x69   : > { %p1601_p4 = scmp.ne.s32.totalorder %s2436_s2, %s1600_s19  ;;  %p1607_p11 = scmp.lt.u32.totalorder %s1600_s19, %s2436_s2 }
  0x6b   : > { %p1603_p5 = pnand %p1601_p4, %p1976_p3 }
  0x6d   : > { %p1604_p6 = pneg %p1603_p5 }
  0x6f   : > { %p1609_p12 = pnand %p1607_p11, %p1604_p6 }
  0x71   : > { %1612 = shalt.err (!%p1609_p12)
}
  0x72   : > { %s1613_s9 = scalar_lea.vmem %s283_s15, 16  ;;  %s1620_s10 = scalar_lea.vmem %s283_s15, 32 }
  0x73   : > { %p1614_p13 = scmp.ne.s32.totalorder %s283_s15, %s1613_s9  ;;  %p1621_p8 = scmp.lt.s32.totalorder %s283_s15, %s283_s15 }
  0x74   : > { %p1622_p9 = scmp.lt.s32.totalorder %s1620_s10, %s1613_s9 }
  0x75   : > { %p1616_p0 = pnand %p1614_p13, %p1976_p3 }
  0x76   : > { %p1623_p10 = por %p1622_p9, %p1621_p8 }
  0x77   : > { %p1617_p7 = pneg %p1616_p0 }
  0x79   : > { %p1624_p1 = pnand %p1623_p10, %p1617_p7 }
  0x7b   : > { %1627 = shalt.err (!%p1624_p1)
}
  0x7c   : > { %1427 = dma.hbm_to_vmem [thread:$0]  (!%p1962_p2), %s2436_s2, 16, %s283_s15, [#allocation7]  }
  0x7d   : > { %s1830_s29 = smov [#allocation11]   ;;  %s1831_s22 = smov [#allocation14]  }
  0x7e   : > { %s306_s1 = sshll.u32 %s1830_s29, 4  ;;  %s330_s11 = sshll.u32 %s1831_s22, 4  ;;  %s307_s1 = int_to_ptr.vmem [resolvable:$true] %s306_s1  ;;  %s331_s11 = int_to_ptr.vmem [resolvable:$true] %s330_s11 }
  0x7f   : > { %s1628_s18 = scalar_lea.hbm %s2438_s4, 16 }
  0x80   : > { %p1629_p4 = scmp.ne.s32.totalorder %s2438_s4, %s1628_s18  ;;  %p1635_p11 = scmp.lt.u32.totalorder %s1628_s18, %s2438_s4 }
  0x82   : > { %p1631_p5 = pnand %p1629_p4, %p1976_p3 }
  0x84   : > { %p1632_p6 = pneg %p1631_p5 }
  0x86   : > { %p1637_p12 = pnand %p1635_p11, %p1632_p6 }
  0x88   : > { %1640 = shalt.err (!%p1637_p12)
}
  0x89   : > { %s1641_s15 = scalar_lea.vmem %s307_s1, 16  ;;  %s1648_s10 = scalar_lea.vmem %s307_s1, 32 }
  0x8a   : > { %p1642_p13 = scmp.ne.s32.totalorder %s307_s1, %s1641_s15  ;;  %p1649_p8 = scmp.lt.s32.totalorder %s307_s1, %s307_s1 }
  0x8b   : > { %p1650_p9 = scmp.lt.s32.totalorder %s1648_s10, %s1641_s15 }
  0x8c   : > { %p1644_p0 = pnand %p1642_p13, %p1976_p3 }
  0x8d   : > { %p1651_p10 = por %p1650_p9, %p1649_p8 }
  0x8e   : > { %p1645_p7 = pneg %p1644_p0 }
  0x90   : > { %p1652_p1 = pnand %p1651_p10, %p1645_p7 }
  0x92   : > { %1655 = shalt.err (!%p1652_p1)
}
  0x93   : > { %1433 = dma.hbm_to_vmem [thread:$0]  (!%p1962_p2), %s2438_s4, 16, %s307_s1, [#allocation10]  }
  0x94   : > { %s1656_s16 = scalar_lea.hbm %s2440_s6, 16 }
  0x95   : > { %p1657_p4 = scmp.ne.s32.totalorder %s2440_s6, %s1656_s16  ;;  %p1663_p11 = scmp.lt.u32.totalorder %s1656_s16, %s2440_s6 }
  0x97   : > { %p1659_p5 = pnand %p1657_p4, %p1976_p3 }
  0x99   : > { %p1660_p6 = pneg %p1659_p5 }
  0x9b   : > { %p1665_p12 = pnand %p1663_p11, %p1660_p6 }
  0x9d   : > { %1668 = shalt.err (!%p1665_p12)
}
  0x9e   : > { %s1669_s26 = scalar_lea.vmem %s331_s11, 16  ;;  %s1676_s1 = scalar_lea.vmem %s331_s11, 32 }
  0x9f   : > { %p1670_p13 = scmp.ne.s32.totalorder %s331_s11, %s1669_s26  ;;  %p1677_p8 = scmp.lt.s32.totalorder %s331_s11, %s331_s11 }
  0xa0   : > { %p1678_p9 = scmp.lt.s32.totalorder %s1676_s1, %s1669_s26 }
  0xa1   : > { %p1672_p0 = pnand %p1670_p13, %p1976_p3 }
  0xa2   : > { %p1679_p10 = por %p1678_p9, %p1677_p8 }
  0xa3   : > { %p1673_p7 = pneg %p1672_p0 }
  0xa5   : > { %p1680_p1 = pnand %p1679_p10, %p1673_p7 }
  0xa7   : > { %1683 = shalt.err (!%p1680_p1)
}
  0xa8   : > { %1439 = dma.hbm_to_vmem [thread:$0]  (!%p1962_p2), %s2440_s6, 16, %s331_s11, [#allocation13]  }
  0xa9   : > { %s1832_s10 = smov [#allocation15]   ;;  %s1684_s22 = scalar_lea.hbm %s2441_s7, 16 }
  0xaa   : > { %s341_s17 = sshll.u32 %s1832_s10, 4  ;;  %p1685_p4 = scmp.ne.s32.totalorder %s2441_s7, %s1684_s22  ;;  %s342_s17 = int_to_ptr.vmem [resolvable:$true] %s341_s17 }
  0xab   : > { %p1691_p11 = scmp.lt.u32.totalorder %s1684_s22, %s2441_s7 }
  0xac   : > { %p1687_p5 = pnand %p1685_p4, %p1976_p3 }
  0xae   : > { %p1688_p6 = pneg %p1687_p5 }
  0xb0   : > { %p1693_p12 = pnand %p1691_p11, %p1688_p6 }
  0xb2   : > { %1696 = shalt.err (!%p1693_p12)
}
  0xb3   : > { %s1697_s11 = scalar_lea.vmem %s342_s17, 16  ;;  %s1704_s30 = scalar_lea.vmem %s342_s17, 32 }
  0xb4   : > { %p1698_p13 = scmp.ne.s32.totalorder %s342_s17, %s1697_s11  ;;  %p1705_p8 = scmp.lt.s32.totalorder %s342_s17, %s342_s17 }
  0xb5   : > { %p1706_p9 = scmp.lt.s32.totalorder %s1704_s30, %s1697_s11 }
  0xb6   : > { %p1700_p0 = pnand %p1698_p13, %p1976_p3 }
  0xb7   : > { %p1707_p10 = por %p1706_p9, %p1705_p8 }
  0xb8   : > { %p1701_p7 = pneg %p1700_p0 }
  0xba   : > { %p1708_p1 = pnand %p1707_p10, %p1701_p7 }
  0xbc   : > { %1711 = shalt.err (!%p1708_p1)
}
  0xbd   : > { %1442 = dma.hbm_to_vmem [thread:$0]  (!%p1962_p2), %s2441_s7, 16, %s342_s17, [#allocation16]  }
  0xbe   : > { %p1205_p4 = scmp.ge.s32.totalorder %s1822_s14, 2 }
  0xbf   : > { %p2468_p3 = scmp.ne.s32.totalorder (!%p1205_p4), %s2458_s20, 0 }
  0xc0   : > { %351 = sbr.rel (%p1205_p4) target bundleno = 234 (0xea), region = 48 }
  0xc7   : > { %354 = sbr.rel (!%p2468_p3) target bundleno = 234 (0xea), region = 52  ;;  %s355_s25 = sand.u32 (%p2468_p3), 1, %s1818_s13  }
  0xc8   : > { %s360_s9 = smul.u32 (%p2468_p3), 14, %s1822_s14  ;;  %s2124_s23 = scalar_lea.sflag (%p2468_p3), [#allocation4], %s355_s25 }
  0xc9   : > { %s1389_s15 = smul.u32 (%p2468_p3), 112, %s355_s25 }
  0xca   : > { %s361_s10 = ssub.s32 (%p2468_p3), 25, %s360_s9 }
  0xcb   : > { %p362_p5 = scmp.lt.s32.totalorder (%p2468_p3), %s361_s10, 14  ;;  %s359_s29 = scalar_lea.vmem (%p2468_p3), [#allocation3], %s1389_s15 }
  0xce   : > { %s2491_s10 = smov (!%p362_p5, %s361_s10), 14 }
  0xcf   : > { %s2121_s27 = sshll.u32 %s2491_s10, 7 }
  0xd0   : > { %s366_s17 = ssub.s32 1792, %s2121_s27 }
  0xd1   : > { %367 = vsyncadd %s2124_s23, %s366_s17  ;;  %p1207_p2 = scmp.ne.s32.totalorder %s2121_s27, 0  ;;  %s1259_s20 = smul.u32 1792, %s1822_s14 }
  0xd2   : > { %s372_s22 = sshll.u32 %s359_s29, 4  ;;  %s1716_s26 = scalar_lea.hbm %s2434_s0, 3200  ;;  %s2134_s22 = int_to_ptr.vmem [resolvable:$true] %s372_s22 }
  0xd3   : > { %s2132_s18 = scalar_lea.hbm %s2434_s0, %s1259_s20 }
  0xd4   : > { %s1712_s28 = scalar_lea.hbm %s2132_s18, %s2121_s27  ;;  %p1717_p13 = scmp.lt.u32.totalorder %s2132_s18, %s2434_s0 }
  0xd5   : > { %p1713_p6 = scmp.ne.s32.totalorder %s2132_s18, %s1712_s28  ;;  %p1718_p0 = scmp.lt.u32.totalorder %s1716_s26, %s1712_s28 }
  0xd6   : > { %p1720_p8 = scmp.lt.u32.totalorder %s1712_s28, %s2132_s18 }
  0xd7   : > { %p1714_p11 = pnand %p1713_p6, %p1207_p2  ;;  %p1719_p7 = por %p1718_p0, %p1717_p13 }
  0xd9   : > { %p1715_p12 = pneg %p1714_p11  ;;  %p1721_p9 = por %p1720_p8, %p1719_p7 }
  0xdb   : > { %p1722_p10 = pnand %p1721_p9, %p1715_p12 }
  0xdd   : > { %1725 = shalt.err (!%p1722_p10)
}
  0xde   : > { %s1726_s9 = scalar_lea.vmem %s2134_s22, %s2121_s27  ;;  %s1833_s15 = smov [#allocation3]  }
  0xdf   : > { %p1727_p1 = scmp.ne.s32.totalorder %s2134_s22, %s1726_s9  ;;  %s1730_s10 = sshll.u32 %s1833_s15, 4  ;;  %s1731_s10 = int_to_ptr.vmem [resolvable:$false] %s1730_s10 }
  0xe0   : > { %s1732_s17 = scalar_lea.vmem %s1731_s10, 3584  ;;  %p1733_p6 = scmp.lt.s32.totalorder %s2134_s22, %s1731_s10 }
  0xe1   : > { %p1728_p3 = pnand %p1727_p1, %p1207_p2  ;;  %p1734_p11 = scmp.lt.s32.totalorder %s1732_s17, %s1726_s9 }
  0xe3   : > { %p1729_p5 = pneg %p1728_p3  ;;  %p1735_p13 = por %p1734_p11, %p1733_p6 }
  0xe5   : > { %p1736_p0 = pnand %p1735_p13, %p1729_p5 }
  0xe7   : > { %1739 = shalt.err (!%p1736_p0)
}
  0xe8   : > { %s1834_s29 = smov 128   ;;  %s1835_s20 = smov 8  }
  0xe9   : > { %378 = dma.hbm_to_vmem [thread:$0]  (%p1207_p2), %s2132_s18, %s2121_s27, %s2134_s22, %s2124_s23, %s1834_s29, %s1834_s29, %s1835_s20  }
  0xea PF: > { %p2469_p12 = scmp.ne.s32.totalorder %s2464_s24, 0 }
  0xeb   : > { %s2164_s16 = sand.u32 (!%p2469_p12), 1, %s1814_s12   ;;  %p2470_p7 = scmp.ne.s32.totalorder (!%p2469_p12), %s2459_s21, 0 }
  0xec   : > { %384 = sbr.rel (%p2469_p12) target bundleno = 1143 (0x477), region = 56  ;;  %s387_s28 = scalar_lea.sflag (!%p2469_p12), [#allocation4], %s2164_s16 }
  0xed   : > { %s1390_s19 = smul.u32 (!%p2469_p12), 112, %s2164_s16 }
  0xef   : > { %s2170_s11 = scalar_lea.vmem (!%p2469_p12), [#allocation3], %s1390_s19 }
  0xf3   : > { %1785 = dma.done.wait (%p2470_p7), %s387_s28, 1792  }
  0xf4   : > { %1787 = vsyncadd (%p2470_p7), %s387_s28, 4294965504  ;;  %p2471_p2 = scmp.eq.s32.totalorder %s1915_s8, 0 }
  0xf6   : > { %1789 = dma.done.wait (%p2471_p2), [#allocation7], 144   ;;  %p2472_p8 = pmov %p2471_p2 }
  0xf7   : > { %p2473_p9 = pmov %p2471_p2 }
  0xf8   : > { %1791 = vsyncadd (%p2472_p8), [#allocation7], 4294967152 }
  0xf9   : > { %1793 = dma.done.wait (%p2473_p9), [#allocation10], 528   ;;  %p2474_p10 = pmov %p2471_p2 }
  0xfa   : > { %p2475_p1 = pmov %p2471_p2 }
  0xfb   : > { %1795 = vsyncadd (%p2474_p10), [#allocation10], 4294966768 }
  0xfc   : > { %1797 = dma.done.wait (%p2475_p1), [#allocation13], 272   ;;  %p2476_p3 = pmov %p2475_p1 }
  0xfd   : > { %p2477_p5 = pmov %p2475_p1 }
  0xfe   : > { %1799 = vsyncadd (%p2476_p3), [#allocation13], 4294967024 }
  0xff   : > { %1801 = dma.done.wait (%p2477_p5), [#allocation16], 16   ;;  %p2478_p6 = pmov %p2475_p1 }
 0x100   : > { %v1836_v1 = vmov 0.0   ;;  %vm1837_vm0 = vmmov 0   ;;  %v1509_v2 = vld [vmem:[#allocation6] sm:$0xff]   ;;  %v465_v4 = vld [vmem:[%s2170_s11 + $0x8] sm:$0xff]  ;;  %vm500_vm1 = vcmask 130048   ;;  %v467_v9 = vld [vmem:[%s2170_s11 + $0x18] sm:$0xff] }
 0x101   : > { %1803 = vsyncadd (%p2478_p6), [#allocation16], 4294967280  ;;  %1289 = vmatprep.subr.bf16.mxu0 %v1836_v1  ;;  %1291 = vmatprep.mubr.msk.bf16.mxu0 %vm1837_vm0, %v1836_v1  ;;  %v464_v3 = vld [vmem:[%s2170_s11] sm:$0xff]  ;;  %v473_v7 = vld [vmem:[%s2170_s11 + $0x48] sm:$0xff]  ;;  %vm671_vm2 = vcmask 523264   ;;  %vm812_vm3 = vcmask 261120  }
 0x102   : > { %1387 = vmatprep.subr.bf16.mxu1 %v1836_v1  ;;  %1307 = vmatprep.mubr.msk.bf16.mxu1 %vm1837_vm0, %v1836_v1  ;;  %v478_v5 = vpack.c.bf16 %v465_v4, %v464_v3  ;;  %v472_v6 = vld [vmem:[%s2170_s11 + $0x40] sm:$0xff]  ;;  %v466_v8 = vld [vmem:[%s2170_s11 + $0x10] sm:$0xff]  ;;  %v475_v13 = vld [vmem:[%s2170_s11 + $0x58] sm:$0xff]  ;;  %vm1021_vm4 = vcmask 7168   ;;  %s2341_s21 = scalar_lea.vmem [#allocation17], %s1390_s19  ;;  %s1037_s24 = scalar_lea.sflag [#allocation5], %s2164_s16 }
 0x103   : > { %1290 = vmatpush3.bf16.msra.mxu0 %v1509_v2  ;;  %1388 = vmatpush3.bf16.msra.mxu1 %v1509_v2  ;;  %v482_v10 = vpack.c.bf16 %v473_v7, %v472_v6  ;;  %v1510_v11 = vld [vmem:[#allocation9] sm:$0xff]   ;;  %v1511_v14 = vld [vmem:[#allocation9 + $0x8] sm:$0xff]   ;;  %v479_v15 = vpack.c.bf16 %v467_v9, %v466_v8  ;;  %v1512_v17 = vld [vmem:[#allocation9 + $0x10] sm:$0xff]   ;;  %s2479_s27 = sld [smem:[#allocation27_spill]] }
 0x104   : > { %1319 = vmatprep.subr.bf16.mxu1 %v1836_v1  ;;  %1355 = vmatprep.subr.bf16.mxu0 %v1836_v1  ;;  %v474_v12 = vld [vmem:[%s2170_s11 + $0x50] sm:$0xff]  ;;  %v468_v18 = vld [vmem:[%s2170_s11 + $0x20] sm:$0xff]  ;;  %v469_v19 = vld [vmem:[%s2170_s11 + $0x28] sm:$0xff] }
 0x105   : > { %v483_v16 = vpack.c.bf16 %v475_v13, %v474_v12  ;;  %v476_v20 = vld [vmem:[%s2170_s11 + $0x60] sm:$0xff]  ;;  %v477_v21 = vld [vmem:[%s2170_s11 + $0x68] sm:$0xff]  ;;  %v480_v22 = vpack.c.bf16 %v469_v19, %v468_v18  ;;  %v470_v24 = vld [vmem:[%s2170_s11 + $0x30] sm:$0xff] }
 0x106   : > { %1292 = vmatmul.mubr.msk.bf16.vlgmr.msra.gmra.mrb[0].mxu0 %vm500_vm1, %v478_v5  ;;  %1308 = vmatmul.mubr.msk.bf16.vlgmr.msra.gmra.mrb[0].mxu1 %vm500_vm1, %v482_v10  ;;  %v484_v23 = vpack.c.bf16 %v477_v21, %v476_v20  ;;  %v471_v25 = vld [vmem:[%s2170_s11 + $0x38] sm:$0xff] }
 0x107   : > { %1295 = vmatprep.mubr.msk.bf16.mxu0 %vm1837_vm0, %v1836_v1  ;;  %1311 = vmatprep.mubr.msk.bf16.mxu1 %vm1837_vm0, %v1836_v1  ;;  %v481_v26 = vpack.c.bf16 %v471_v25, %v470_v24  ;;  %v1513_v27 = vld [vmem:[#allocation9 + $0x18] sm:$0xff]   ;;  %v1514_v28 = vld [vmem:[#allocation12] sm:$0xff]   ;;  %v1515_v29 = vld [vmem:[#allocation12 + $0x8] sm:$0xff]  }
 0x108   : > { %1320 = vmatpush3.bf16.msra.mxu1 %v1510_v11  ;;  %1356 = vmatpush3.bf16.msra.mxu0 %v1514_v28  ;;  %v2239_v30 = vld [vmem:[#allocation8] ss:$0 sm:$0xff] }
 0x109   : > { %1321 = vmatprep.subr.bf16.mxu1 %v1836_v1  ;;  %1357 = vmatprep.subr.bf16.mxu0 %v1836_v1  ;;  %p2480_p11 = scmp.ne.s32.totalorder %s2479_s27, 0 }
 0x10a   : > { %s1044_s23 = smul.u32 (%p2480_p11), 14, %s1915_s8 }
 0x10c   : > { %1322 = vmatpush3.bf16.msra.mxu1 %v1511_v14  ;;  %1358 = vmatpush3.bf16.msra.mxu0 %v1515_v29  ;;  %s1045_s22 = ssub.s32 (%p2480_p11), 25, %s1044_s23 }
 0x10d   : > { %1323 = vmatprep.subr.bf16.mxu1 %v1836_v1  ;;  %p1046_p13 = scmp.lt.s32.totalorder (%p2480_p11), %s1045_s22, 14 }
 0x10e   : > { %1296 = vmatmul.mubr.msk.bf16.gmra.mrb[4].mxu0 %vm500_vm1, %v479_v15  ;;  %1312 = vmatmul.mubr.msk.bf16.gmra.mrb[4].mxu1 %vm500_vm1, %v483_v16 }
 0x10f   : > { %1299 = vmatprep.mubr.msk.bf16.mxu0 %vm1837_vm0, %v1836_v1  ;;  %1315 = vmatprep.mubr.msk.bf16.mxu1 %vm1837_vm0, %v1836_v1 }
 0x110   : > { %1324 = vmatpush3.bf16.msra.mxu1 %v1512_v17 }
 0x111   : > { %1325 = vmatprep.subr.bf16.mxu1 %v1836_v1 }
 0x114   : > { %1326 = vmatpush3.bf16.msra.mxu1 %v1513_v27 }
 0x116   : > { %1300 = vmatmul.mubr.msk.bf16.gmra.mrb[8].mxu0 %vm500_vm1, %v480_v22  ;;  %1316 = vmatmul.mubr.msk.bf16.gmra.mrb[8].mxu1 %vm500_vm1, %v484_v23 }
 0x117   : > { %1303 = vmatprep.mubr.msk.bf16.mxu0 %vm1837_vm0, %v1836_v1  ;;  %1327 = vmatprep.mubr.msk.bf16.mxu1 %vm1837_vm0, %v1836_v1 }
 0x11e   : > { %1304 = vmatmul.mubr.msk.bf16.gmra.mrb[12].mxu0 %vm500_vm1, %v481_v26 }
 0x11f   : > { %1359 = vmatprep.mubr.msk.bf16.mxu0 %vm1837_vm0, %v1836_v1 }
 0x1d9   : > { %v556_v31 = vpop.f32.mrb[0].mxu0  ;;  %v588_v35 = vpop.f32.mrb[0].mxu1 }
 0x1da   : > { %v557_v32 = vadd.f32 %v2239_v30, %v556_v31  ;;  %v1293_v33 = vpop.f32.mrb[1].mxu0  ;;  %v589_v38 = vadd.f32 %v2239_v30, %v588_v35  ;;  %v1309_v39 = vpop.f32.mrb[1].mxu1 }
 0x1db   : > { %v559_v34 = vpop.f32.mrb[2].mxu0  ;;  %v591_v40 = vpop.f32.mrb[2].mxu1 }
 0x1dc   : > { %v560_v36 = vadd.f32 %v2239_v30, %v559_v34  ;;  %v1294_v37 = vpop.f32.mrb[3].mxu0  ;;  %v611_v41 = vmax.f32 %v557_v32, 0.0  ;;  %v619_v43 = vmax.f32 %v589_v38, 0.0  ;;  %v592_v44 = vadd.f32 %v2239_v30, %v591_v40  ;;  %v1310_v45 = vpop.f32.mrb[3].mxu1 }
 0x1de   : > { %v612_v42 = vmax.f32 %v560_v36, 0.0  ;;  %v620_v47 = vmax.f32 %v592_v44, 0.0 }
 0x1e0   : > { %v625_v46 = vpack.c.bf16 %v612_v42, %v611_v41  ;;  %v629_v51 = vpack.c.bf16 %v620_v47, %v619_v43 }
 0x1e1   : > { %v564_v48 = vpop.f32.mrb[4].mxu0  ;;  %v596_v53 = vpop.f32.mrb[4].mxu1 }
 0x1e2   : > { %v565_v49 = vadd.f32 %v2239_v30, %v564_v48  ;;  %v1297_v50 = vpop.f32.mrb[5].mxu0  ;;  %1328 = vmatmul.mubr.msk.bf16.vlgmr.msra.gmra.mrb[12].mxu1 %vm671_vm2, %v625_v46  ;;  %v597_v56 = vadd.f32 %v2239_v30, %v596_v53  ;;  %v1313_v57 = vpop.f32.mrb[5].mxu1 }
 0x1e3   : > { %v567_v52 = vpop.f32.mrb[6].mxu0  ;;  %1331 = vmatprep.mubr.msk.bf16.mxu1 %vm1837_vm0, %v1836_v1  ;;  %v599_v58 = vpop.f32.mrb[6].mxu1 }
 0x1e4   : > { %v568_v54 = vadd.f32 %v2239_v30, %v567_v52  ;;  %v1298_v55 = vpop.f32.mrb[7].mxu0  ;;  %v613_v59 = vmax.f32 %v565_v49, 0.0  ;;  %v621_v61 = vmax.f32 %v597_v56, 0.0  ;;  %v600_v62 = vadd.f32 %v2239_v30, %v599_v58  ;;  %v1314_v63 = vpop.f32.mrb[7].mxu1 }
 0x1e6   : > { %v614_v60 = vmax.f32 %v568_v54, 0.0  ;;  %v622_v2 = vmax.f32 %v600_v62, 0.0 }
 0x1e8   : > { %v626_v0 = vpack.c.bf16 %v614_v60, %v613_v59  ;;  %v630_v6 = vpack.c.bf16 %v622_v2, %v621_v61 }
 0x1e9   : > { %v572_v3 = vpop.f32.mrb[8].mxu0  ;;  %v604_v8 = vpop.f32.mrb[8].mxu1 }
 0x1ea   : > { %v573_v4 = vadd.f32 %v2239_v30, %v572_v3  ;;  %v1301_v5 = vpop.f32.mrb[9].mxu0  ;;  %1332 = vmatmul.mubr.msk.bf16.gmra.mrb[16].mxu1 %vm671_vm2, %v626_v0  ;;  %v605_v11 = vadd.f32 %v2239_v30, %v604_v8  ;;  %v1317_v12 = vpop.f32.mrb[9].mxu1 }
 0x1eb   : > { %v575_v7 = vpop.f32.mrb[10].mxu0  ;;  %1335 = vmatprep.mubr.msk.bf16.mxu1 %vm1837_vm0, %v1836_v1  ;;  %v607_v13 = vpop.f32.mrb[10].mxu1 }
 0x1ec   : > { %v576_v9 = vadd.f32 %v2239_v30, %v575_v7  ;;  %v1302_v10 = vpop.f32.mrb[11].mxu0  ;;  %v615_v14 = vmax.f32 %v573_v4, 0.0  ;;  %v623_v16 = vmax.f32 %v605_v11, 0.0  ;;  %v608_v17 = vadd.f32 %v2239_v30, %v607_v13  ;;  %v1318_v18 = vpop.f32.mrb[11].mxu1 }
 0x1ed   : > { %v2293_v18 = vld [vmem:[#allocation14] ss:$0 sm:$0xff] }
 0x1ee   : > { %v616_v15 = vmax.f32 %v576_v9, 0.0  ;;  %v624_v20 = vmax.f32 %v608_v17, 0.0 }
 0x1f0   : > { %v627_v19 = vpack.c.bf16 %v616_v15, %v615_v14  ;;  %v631_v24 = vpack.c.bf16 %v624_v20, %v623_v16 }
 0x1f1   : > { %v580_v21 = vpop.f32.mrb[12].mxu0 }
 0x1f2   : > { %v581_v22 = vadd.f32 %v2239_v30, %v580_v21  ;;  %v1305_v23 = vpop.f32.mrb[13].mxu0  ;;  %1336 = vmatmul.mubr.msk.bf16.gmra.mrb[20].mxu1 %vm671_vm2, %v627_v19 }
 0x1f3   : > { %v583_v25 = vpop.f32.mrb[14].mxu0  ;;  %1339 = vmatprep.mubr.msk.bf16.mxu1 %vm1837_vm0, %v1836_v1  ;;  %v2296_v23 = vld [vmem:[#allocation15] ss:$0 sm:$0xff] }
 0x1f4   : > { %v584_v26 = vadd.f32 %v2239_v30, %v583_v25  ;;  %v1306_v27 = vpop.f32.mrb[15].mxu0  ;;  %v617_v28 = vmax.f32 %v581_v22, 0.0  ;;  %v1228_v30 = vld [vmem:[#allocation11] ss:$0 sm:$0xff] }
 0x1f6   : > { %v618_v29 = vmax.f32 %v584_v26, 0.0 }
 0x1f8   : > { %v628_v31 = vpack.c.bf16 %v618_v29, %v617_v28 }
 0x1fa   : > { %1340 = vmatmul.mubr.msk.bf16.gmra.mrb[24].mxu1 %vm671_vm2, %v628_v31 }
 0x1fb   : > { %1343 = vmatprep.mubr.msk.bf16.mxu1 %vm1837_vm0, %v1836_v1 }
 0x202   : > { %1344 = vmatmul.mubr.msk.bf16.gmra.mrb[28].mxu1 %vm671_vm2, %v629_v51 }
 0x203   : > { %1347 = vmatprep.mubr.msk.bf16.mxu1 %vm1837_vm0, %v1836_v1 }
 0x20a   : > { %1348 = vmatmul.mubr.msk.bf16.gmra.mrb[32].mxu1 %vm671_vm2, %v630_v6 }
 0x20b   : > { %1351 = vmatprep.mubr.msk.bf16.mxu1 %vm1837_vm0, %v1836_v1 }
 0x212   : > { %1352 = vmatmul.mubr.msk.bf16.gmra.mrb[36].mxu1 %vm671_vm2, %v631_v24 }
 0x2b5   : > { %v727_v32 = vpop.f32.mrb[12].mxu1 }
 0x2b6   : > { %v1329_v33 = vpop.f32.mrb[13].mxu1  ;;  %v728_v35 = vadd.f32 %v1228_v30, %v727_v32 }
 0x2b7   : > { %v730_v34 = vpop.f32.mrb[14].mxu1 }
 0x2b8   : > { %v731_v36 = vadd.f32 %v1228_v30, %v730_v34  ;;  %v1330_v37 = vpop.f32.mrb[15].mxu1 }
 0x2ba   : > { %v782_v38 = vpack.c.bf16 %v731_v36, %v728_v35 }
 0x2bc   : > { %1360 = vmatmul.mubr.msk.bf16.vlgmr.msra.gmra.mrb[16].mxu0 %vm812_vm3, %v782_v38 }
 0x2bd   : > { %v735_v39 = vpop.f32.mrb[16].mxu1  ;;  %1363 = vmatprep.mubr.msk.bf16.mxu0 %vm1837_vm0, %v1836_v1 }
 0x2be   : > { %v1333_v40 = vpop.f32.mrb[17].mxu1  ;;  %v736_v42 = vadd.f32 %v1228_v30, %v735_v39 }
 0x2bf   : > { %v738_v41 = vpop.f32.mrb[18].mxu1 }
 0x2c0   : > { %v739_v43 = vadd.f32 %v1228_v30, %v738_v41  ;;  %v1334_v44 = vpop.f32.mrb[19].mxu1 }
 0x2c2   : > { %v783_v45 = vpack.c.bf16 %v739_v43, %v736_v42 }
 0x2c4   : > { %1364 = vmatmul.mubr.msk.bf16.gmra.mrb[20].mxu0 %vm812_vm3, %v783_v45 }
 0x2c5   : > { %v743_v46 = vpop.f32.mrb[20].mxu1  ;;  %1367 = vmatprep.mubr.msk.bf16.mxu0 %vm1837_vm0, %v1836_v1 }
 0x2c6   : > { %v1337_v47 = vpop.f32.mrb[21].mxu1  ;;  %v744_v49 = vadd.f32 %v1228_v30, %v743_v46 }
 0x2c7   : > { %v746_v48 = vpop.f32.mrb[22].mxu1 }
 0x2c8   : > { %v747_v50 = vadd.f32 %v1228_v30, %v746_v48  ;;  %v1338_v51 = vpop.f32.mrb[23].mxu1 }
 0x2ca   : > { %v784_v52 = vpack.c.bf16 %v747_v50, %v744_v49 }
 0x2cc   : > { %1368 = vmatmul.mubr.msk.bf16.gmra.mrb[24].mxu0 %vm812_vm3, %v784_v52 }
 0x2cd   : > { %v751_v53 = vpop.f32.mrb[24].mxu1  ;;  %1371 = vmatprep.mubr.msk.bf16.mxu0 %vm1837_vm0, %v1836_v1 }
 0x2ce   : > { %v1341_v54 = vpop.f32.mrb[25].mxu1  ;;  %v752_v56 = vadd.f32 %v1228_v30, %v751_v53 }
 0x2cf   : > { %v754_v55 = vpop.f32.mrb[26].mxu1 }
 0x2d0   : > { %v755_v57 = vadd.f32 %v1228_v30, %v754_v55  ;;  %v1342_v58 = vpop.f32.mrb[27].mxu1 }
 0x2d2   : > { %v785_v59 = vpack.c.bf16 %v755_v57, %v752_v56 }
 0x2d4   : > { %1372 = vmatmul.mubr.msk.bf16.gmra.mrb[28].mxu0 %vm812_vm3, %v785_v59 }
 0x2d5   : > { %v759_v60 = vpop.f32.mrb[28].mxu1  ;;  %1375 = vmatprep.mubr.msk.bf16.mxu0 %vm1837_vm0, %v1836_v1 }
 0x2d6   : > { %v1345_v61 = vpop.f32.mrb[29].mxu1  ;;  %v760_v63 = vadd.f32 %v1228_v30, %v759_v60 }
 0x2d7   : > { %v762_v62 = vpop.f32.mrb[30].mxu1 }
 0x2d8   : > { %v763_v0 = vadd.f32 %v1228_v30, %v762_v62  ;;  %v1346_v2 = vpop.f32.mrb[31].mxu1 }
 0x2da   : > { %v786_v3 = vpack.c.bf16 %v763_v0, %v760_v63 }
 0x2dc   : > { %1376 = vmatmul.mubr.msk.bf16.gmra.mrb[32].mxu0 %vm812_vm3, %v786_v3 }
 0x2dd   : > { %v767_v4 = vpop.f32.mrb[32].mxu1  ;;  %1379 = vmatprep.mubr.msk.bf16.mxu0 %vm1837_vm0, %v1836_v1 }
 0x2de   : > { %v1349_v5 = vpop.f32.mrb[33].mxu1  ;;  %v768_v7 = vadd.f32 %v1228_v30, %v767_v4 }
 0x2df   : > { %v770_v6 = vpop.f32.mrb[34].mxu1 }
 0x2e0   : > { %v771_v8 = vadd.f32 %v1228_v30, %v770_v6  ;;  %v1350_v9 = vpop.f32.mrb[35].mxu1 }
 0x2e2   : > { %v787_v10 = vpack.c.bf16 %v771_v8, %v768_v7 }
 0x2e4   : > { %1380 = vmatmul.mubr.msk.bf16.gmra.mrb[36].mxu0 %vm812_vm3, %v787_v10 }
 0x2e5   : > { %v775_v11 = vpop.f32.mrb[36].mxu1  ;;  %1383 = vmatprep.mubr.msk.bf16.mxu0 %vm1837_vm0, %v1836_v1 }
 0x2e6   : > { %v1353_v12 = vpop.f32.mrb[37].mxu1  ;;  %v776_v14 = vadd.f32 %v1228_v30, %v775_v11 }
 0x2e7   : > { %v778_v13 = vpop.f32.mrb[38].mxu1 }
 0x2e8   : > { %v779_v15 = vadd.f32 %v1228_v30, %v778_v13  ;;  %v1354_v16 = vpop.f32.mrb[39].mxu1 }
 0x2ea   : > { %v788_v17 = vpack.c.bf16 %v779_v15, %v776_v14 }
 0x2ec   : > { %1384 = vmatmul.mubr.msk.bf16.gmra.mrb[40].mxu0 %vm812_vm3, %v788_v17 }
 0x38f   : > { %v868_v19 = vpop.f32.mrb[16].mxu0 }
 0x390   : > { %v869_v20 = vadd.f32 %v2293_v18, %v868_v19  ;;  %v1361_v21 = vpop.f32.mrb[17].mxu0 }
 0x391   : > { %v871_v22 = vpop.f32.mrb[18].mxu0 }
 0x392   : > { %v923_v24 = vmax.f32 %v869_v20, 0.0  ;;  %v872_v1 = vadd.f32 %v2293_v18, %v871_v22  ;;  %v1362_v25 = vpop.f32.mrb[19].mxu0 }
 0x394   : > { %v924_v26 = vmax.f32 %v872_v1, 0.0  ;;  %v944_v27 = vmul.f32 %v2296_v23, %v923_v24 }
 0x396   : > { %v958_v28 = vsel %vm500_vm1, %v944_v27, 0.0  ;;  %v945_v29 = vmul.f32 %v2296_v23, %v924_v26 }
 0x397   : > { %959 = vadd.xlane.f32.xlu0 %v958_v28  ;;  %v876_v31 = vpop.f32.mrb[20].mxu0 }
 0x398   : > { %v877_v30 = vadd.f32 %v2293_v18, %v876_v31  ;;  %v1365_v32 = vpop.f32.mrb[21].mxu0  ;;  %v961_v37 = vsel %vm500_vm1, %v945_v29, 0.0 }
 0x399   : > { %v879_v33 = vpop.f32.mrb[22].mxu0 }
 0x39a   : > { %v925_v34 = vmax.f32 %v877_v30, 0.0  ;;  %v880_v35 = vadd.f32 %v2293_v18, %v879_v33  ;;  %v1366_v36 = vpop.f32.mrb[23].mxu0 }
 0x39b   : > { %962 = vadd.xlane.f32.xlu0 %v961_v37 }
 0x39c   : > { %v926_v38 = vmax.f32 %v880_v35, 0.0  ;;  %v946_v39 = vmul.f32 %v2296_v23, %v925_v34 }
 0x39e   : > { %v964_v40 = vsel %vm500_vm1, %v946_v39, 0.0  ;;  %v947_v41 = vmul.f32 %v2296_v23, %v926_v38 }
 0x39f   : > { %965 = vadd.xlane.f32.xlu1 %v964_v40  ;;  %v884_v42 = vpop.f32.mrb[24].mxu0 }
 0x3a0   : > { %v885_v43 = vadd.f32 %v2293_v18, %v884_v42  ;;  %v1369_v44 = vpop.f32.mrb[25].mxu0  ;;  %v967_v49 = vsel %vm500_vm1, %v947_v41, 0.0  ;;  %v1251_v41 = vld [vmem:[#allocation2] ss:$0 sm:$0xff] }
 0x3a1   : > { %v887_v45 = vpop.f32.mrb[26].mxu0 }
 0x3a2   : > { %v927_v46 = vmax.f32 %v885_v43, 0.0  ;;  %v888_v47 = vadd.f32 %v2293_v18, %v887_v45  ;;  %v1370_v48 = vpop.f32.mrb[27].mxu0 }
 0x3a3   : > { %968 = vadd.xlane.f32.xlu1 %v967_v49 }
 0x3a4   : > { %v928_v50 = vmax.f32 %v888_v47, 0.0  ;;  %v948_v51 = vmul.f32 %v2296_v23, %v927_v46 }
 0x3a6   : > { %v970_v52 = vsel %vm500_vm1, %v948_v51, 0.0  ;;  %v949_v53 = vmul.f32 %v2296_v23, %v928_v50 }
 0x3a7   : > { %971 = vadd.xlane.f32.xlu0 %v970_v52  ;;  %v892_v54 = vpop.f32.mrb[28].mxu0 }
 0x3a8   : > { %v893_v55 = vadd.f32 %v2293_v18, %v892_v54  ;;  %v1373_v56 = vpop.f32.mrb[29].mxu0  ;;  %v973_v57 = vsel %vm500_vm1, %v949_v53, 0.0 }
 0x3a9   : > { %974 = vadd.xlane.f32.xlu1 %v973_v57  ;;  %v895_v58 = vpop.f32.mrb[30].mxu0 }
 0x3aa   : > { %v929_v59 = vmax.f32 %v893_v55, 0.0  ;;  %v896_v60 = vadd.f32 %v2293_v18, %v895_v58  ;;  %v1374_v61 = vpop.f32.mrb[31].mxu0 }
 0x3ac   : > { %v930_v62 = vmax.f32 %v896_v60, 0.0  ;;  %v950_v63 = vmul.f32 %v2296_v23, %v929_v59 }
 0x3ae   : > { %v976_v0 = vsel %vm500_vm1, %v950_v63, 0.0  ;;  %v951_v2 = vmul.f32 %v2296_v23, %v930_v62 }
 0x3af   : > { %977 = vadd.xlane.f32.xlu0 %v976_v0  ;;  %v900_v3 = vpop.f32.mrb[32].mxu0 }
 0x3b0   : > { %v901_v4 = vadd.f32 %v2293_v18, %v900_v3  ;;  %v1377_v5 = vpop.f32.mrb[33].mxu0  ;;  %v979_v6 = vsel %vm500_vm1, %v951_v2, 0.0 }
 0x3b1   : > { %980 = vadd.xlane.f32.xlu1 %v979_v6  ;;  %v903_v7 = vpop.f32.mrb[34].mxu0 }
 0x3b2   : > { %v931_v8 = vmax.f32 %v901_v4, 0.0  ;;  %v904_v9 = vadd.f32 %v2293_v18, %v903_v7  ;;  %v1378_v10 = vpop.f32.mrb[35].mxu0 }
 0x3b4   : > { %v932_v11 = vmax.f32 %v904_v9, 0.0  ;;  %v952_v12 = vmul.f32 %v2296_v23, %v931_v8 }
 0x3b6   : > { %v982_v13 = vsel %vm500_vm1, %v952_v12, 0.0  ;;  %v953_v14 = vmul.f32 %v2296_v23, %v932_v11 }
 0x3b7   : > { %983 = vadd.xlane.f32.xlu0 %v982_v13  ;;  %v908_v15 = vpop.f32.mrb[36].mxu0 }
 0x3b8   : > { %v909_v16 = vadd.f32 %v2293_v18, %v908_v15  ;;  %v1381_v17 = vpop.f32.mrb[37].mxu0  ;;  %v985_v19 = vsel %vm500_vm1, %v953_v14, 0.0 }
 0x3b9   : > { %986 = vadd.xlane.f32.xlu1 %v985_v19  ;;  %v911_v20 = vpop.f32.mrb[38].mxu0 }
 0x3ba   : > { %v933_v21 = vmax.f32 %v909_v16, 0.0  ;;  %v912_v22 = vadd.f32 %v2293_v18, %v911_v20  ;;  %v1382_v24 = vpop.f32.mrb[39].mxu0 }
 0x3bc   : > { %v934_v1 = vmax.f32 %v912_v22, 0.0  ;;  %v954_v25 = vmul.f32 %v2296_v23, %v933_v21 }
 0x3be   : > { %v988_v26 = vsel %vm500_vm1, %v954_v25, 0.0  ;;  %v955_v27 = vmul.f32 %v2296_v23, %v934_v1 }
 0x3bf   : > { %989 = vadd.xlane.f32.xlu0 %v988_v26  ;;  %v916_v28 = vpop.f32.mrb[40].mxu0 }
 0x3c0   : > { %v917_v29 = vadd.f32 %v2293_v18, %v916_v28  ;;  %v1385_v31 = vpop.f32.mrb[41].mxu0  ;;  %v991_v30 = vsel %vm500_vm1, %v955_v27, 0.0 }
 0x3c1   : > { %992 = vadd.xlane.f32.xlu1 %v991_v30  ;;  %v919_v32 = vpop.f32.mrb[42].mxu0 }
 0x3c2   : > { %v935_v33 = vmax.f32 %v917_v29, 0.0  ;;  %v920_v34 = vadd.f32 %v2293_v18, %v919_v32  ;;  %v1386_v35 = vpop.f32.mrb[43].mxu0 }
 0x3c4   : > { %v936_v36 = vmax.f32 %v920_v34, 0.0  ;;  %v956_v37 = vmul.f32 %v2296_v23, %v935_v33 }
 0x3c6   : > { %v994_v38 = vsel %vm500_vm1, %v956_v37, 0.0  ;;  %v957_v39 = vmul.f32 %v2296_v23, %v936_v36 }
 0x3c7   : > { %995 = vadd.xlane.f32.xlu0 %v994_v38 }
 0x3c8   : > { %v997_v40 = vsel %vm500_vm1, %v957_v39, 0.0 }
 0x3c9   : > { %998 = vadd.xlane.f32.xlu1 %v997_v40 }
 0x424   : > { %v960_v42 = vpop.xlane.xlu0 %959 }
 0x425   : > { %v1007_v43 = vadd.f32 %v1251_v41, %v960_v42 }
 0x427   : > { %1022 = vst.msk [vmem:[%s2341_s21] sm:$0xff] %vm1021_vm4, %v1007_v43 }
 0x428   : > { %v963_v18 = vpop.xlane.xlu0 %962 }
 0x429   : > { %v1008_v23 = vadd.f32 %v1251_v41, %v963_v18 }
 0x42b   : > { %1023 = vst.msk [vmem:[%s2341_s21 + $0x8] sm:$0xff] %vm1021_vm4, %v1008_v23 }
 0x42c   : > { %v966_v44 = vpop.xlane.xlu1 %965 }
 0x42d   : > { %v1009_v45 = vadd.f32 %v1251_v41, %v966_v44 }
 0x42f   : > { %1024 = vst.msk [vmem:[%s2341_s21 + $0x10] sm:$0xff] %vm1021_vm4, %v1009_v45 }
 0x430   : > { %v969_v46 = vpop.xlane.xlu1 %968 }
 0x431   : > { %v1010_v47 = vadd.f32 %v1251_v41, %v969_v46 }
 0x433   : > { %1025 = vst.msk [vmem:[%s2341_s21 + $0x18] sm:$0xff] %vm1021_vm4, %v1010_v47 }
 0x434   : > { %v972_v48 = vpop.xlane.xlu0 %971 }
 0x435   : > { %v1011_v49 = vadd.f32 %v1251_v41, %v972_v48 }
 0x436   : > { %v975_v50 = vpop.xlane.xlu1 %974 }
 0x437   : > { %1026 = vst.msk [vmem:[%s2341_s21 + $0x20] sm:$0xff] %vm1021_vm4, %v1011_v49  ;;  %v1012_v51 = vadd.f32 %v1251_v41, %v975_v50 }
 0x439   : > { %1027 = vst.msk [vmem:[%s2341_s21 + $0x28] sm:$0xff] %vm1021_vm4, %v1012_v51 }
 0x43c   : > { %v978_v52 = vpop.xlane.xlu0 %977 }
 0x43d   : > { %v1013_v53 = vadd.f32 %v1251_v41, %v978_v52 }
 0x43e   : > { %v981_v54 = vpop.xlane.xlu1 %980 }
 0x43f   : > { %1028 = vst.msk [vmem:[%s2341_s21 + $0x30] sm:$0xff] %vm1021_vm4, %v1013_v53  ;;  %v1014_v55 = vadd.f32 %v1251_v41, %v981_v54 }
 0x441   : > { %1029 = vst.msk [vmem:[%s2341_s21 + $0x38] sm:$0xff] %vm1021_vm4, %v1014_v55 }
 0x444   : > { %v984_v56 = vpop.xlane.xlu0 %983 }
 0x445   : > { %v1015_v57 = vadd.f32 %v1251_v41, %v984_v56 }
 0x446   : > { %v987_v58 = vpop.xlane.xlu1 %986 }
 0x447   : > { %1030 = vst.msk [vmem:[%s2341_s21 + $0x40] sm:$0xff] %vm1021_vm4, %v1015_v57  ;;  %v1016_v59 = vadd.f32 %v1251_v41, %v987_v58 }
 0x449   : > { %1031 = vst.msk [vmem:[%s2341_s21 + $0x48] sm:$0xff] %vm1021_vm4, %v1016_v59 }
 0x44c   : > { %v990_v60 = vpop.xlane.xlu0 %989 }
 0x44d   : > { %v1017_v61 = vadd.f32 %v1251_v41, %v990_v60 }
 0x44e   : > { %v993_v62 = vpop.xlane.xlu1 %992 }
 0x44f   : > { %1032 = vst.msk [vmem:[%s2341_s21 + $0x50] sm:$0xff] %vm1021_vm4, %v1017_v61  ;;  %v1018_v63 = vadd.f32 %v1251_v41, %v993_v62 }
 0x451   : > { %1033 = vst.msk [vmem:[%s2341_s21 + $0x58] sm:$0xff] %vm1021_vm4, %v1018_v63 }
 0x453   : > { %1043 = sbr.rel (!%p2480_p11) target bundleno = 1143 (0x477), region = 92 }
 0x454   : > { %v996_v0 = vpop.xlane.xlu0 %995 }
 0x455   : > { %v1019_v2 = vadd.f32 %v1251_v41, %v996_v0 }
 0x456   : > { %v999_v3 = vpop.xlane.xlu1 %998 }
 0x457   : > { %1034 = vst.msk [vmem:[%s2341_s21 + $0x60] sm:$0xff] %vm1021_vm4, %v1019_v2  ;;  %v1020_v4 = vadd.f32 %v1251_v41, %v999_v3 }
 0x459   : > { %1035 = vst.msk [vmem:[%s2341_s21 + $0x68] sm:$0xff] %vm1021_vm4, %v1020_v4 }
 0x45a   : > { %s2493_s22 = smov (!%p1046_p13, %s1045_s22), 14 }
 0x45b   : > { %s2375_s18 = sshll.u32 %s2493_s22, 7 }
 0x45c   : > { %s1050_s30 = ssub.s32 1792, %s2375_s18 }
 0x45d   : > { %1051 = vsyncadd %s1037_s24, %s1050_s30  ;;  %p1253_p0 = scmp.ne.s32.totalorder %s2375_s18, 0  ;;  %s1260_s26 = smul.u32 1792, %s1915_s8 }
 0x45e   : > { %s1056_s1 = sshll.u32 %s2341_s21, 4  ;;  %s2481_s15 = sld [smem:[#allocation30_spill]]  ;;  %s2388_s1 = int_to_ptr.vmem [resolvable:$true] %s1056_s1 }
 0x45f   : > { %s1740_s17 = scalar_lea.vmem %s2388_s1, %s2375_s18  ;;  %s1838_s29 = smov [#allocation17]  }
 0x460   : > { %p1741_p12 = scmp.ne.s32.totalorder %s2388_s1, %s1740_s17  ;;  %s1744_s20 = sshll.u32 %s1838_s29, 4  ;;  %s1745_s20 = int_to_ptr.vmem [resolvable:$false] %s1744_s20 }
 0x461   : > { %s1746_s8 = scalar_lea.vmem %s1745_s20, 3584  ;;  %p1747_p8 = scmp.lt.s32.totalorder %s2388_s1, %s1745_s20 }
 0x462   : > { %p1742_p7 = pnand %p1741_p12, %p1253_p0  ;;  %p1748_p9 = scmp.lt.s32.totalorder %s1746_s8, %s1740_s17 }
 0x464   : > { %s2386_s10 = scalar_lea.hbm %s2481_s15, %s1260_s26  ;;  %p1743_p2 = pneg %p1742_p7 }
 0x465   : > { %p1749_p10 = por %p1748_p9, %p1747_p8 }
 0x467   : > { %p1750_p1 = pnand %p1749_p10, %p1743_p2 }
 0x469   : > { %1753 = shalt.err (!%p1750_p1)
}
 0x46a   : > { %s1754_s19 = scalar_lea.hbm %s2386_s10, %s2375_s18  ;;  %s1758_s21 = scalar_lea.hbm %s2481_s15, 3200 }
 0x46b   : > { %p1755_p3 = scmp.ne.s32.totalorder %s2386_s10, %s1754_s19  ;;  %p1759_p11 = scmp.lt.u32.totalorder %s2386_s10, %s2481_s15 }
 0x46c   : > { %p1760_p13 = scmp.lt.u32.totalorder %s1758_s21, %s1754_s19  ;;  %p1762_p7 = scmp.lt.u32.totalorder %s1754_s19, %s2386_s10 }
 0x46d   : > { %p1756_p5 = pnand %p1755_p3, %p1253_p0 }
 0x46e   : > { %p1761_p12 = por %p1760_p13, %p1759_p11 }
 0x46f   : > { %p1757_p6 = pneg %p1756_p5 }
 0x470   : > { %p1763_p2 = por %p1762_p7, %p1761_p12 }
 0x472   : > { %p1764_p8 = pnand %p1763_p2, %p1757_p6 }
 0x474   : > { %1767 = shalt.err (!%p1764_p8)
}
 0x475   : > { %s1839_s22 = smov 128   ;;  %s1840_s30 = smov 8  }
 0x476   : > { %1062 = dma.vmem_to_hbm [thread:$0]  (%p1253_p0), %s2388_s1, %s2375_s18, %s2386_s10, %s1037_s24, %s1839_s22, %s1839_s22, %s1840_s30  }
 0x477 PF: > { %s2482_s26 = sld [smem:[#allocation24_spill]]  ;;  %s2483_s25 = sld [smem:[#allocation28_spill]] }
 0x47d   : > { %s1071_s9 = sand.u32 1, %s2482_s26   ;;  %p2484_p9 = scmp.ne.s32.totalorder %s2483_s25, 0 }
 0x47e   : > { %s1072_s17 = scalar_lea.sflag [#allocation5], %s1071_s9 }
 0x47f   : > { %p1444_p10 = pnand %p1205_p4, %p2484_p9 }
 0x481   : > { %1805 = dma.done.wait (!%p1444_p10), %s1072_s17, 1792  }
 0x482   : > { %1807 = vsyncadd (!%p1444_p10), %s1072_s17, 4294965504  ;;  %s2485_s14 = sld [smem:[#allocation25_spill]]  ;;  %s2486_s29 = sld [smem:[#allocation26_spill]] }
 0x483   : > { %s2487_s11 = smov %s1814_s12  ;;  %s2488_s12 = smov %s1818_s13 }
 0x488   : > { %p28_p1 = scmp.ge.s32.totalorder %s2485_s14, 4   ;;  %s2489_s13 = smov %s2486_s29 }
 0x48a   :  { %30 = sbr.rel (!%p28_p1) target bundleno = 12 (0xc), region = 129 }
 0x491   :  { %1077 = vsyncpa [#allocation4], 1 }
 0x492   :  { %1079 = vsyncpa [#allocation4 + $0x1], 1 }
 0x493   :  { %1080 = vsyncpa [#allocation7], 1 }
 0x494   :  { %1081 = vsyncpa [#allocation10], 1 }
 0x495   :  { %1082 = vsyncpa [#allocation13], 1 }
 0x496   :  { %1083 = vsyncpa [#allocation16], 1 }
 0x497   :  { %1084 = vsyncpa [#allocation5], 1 }
 0x498   :  { %1086 = vsyncpa [#allocation5 + $0x1], 1 }

</bundles_post_ra>
